<compile_context>
chip_gen: v7x
topology: tpu7x:2x2x1
jax: 0.10.0
libtpu: 0.0.40
codegen_flags: <defaults>
</compile_context>

<pallas_src>
import functools

import jax
import jax.numpy as jnp
from jax.experimental import pallas as pl
from jax.experimental.pallas import tpu as pltpu


def _tagging_kernel(x_ref, w1t_ref, b1c_ref, wht_ref, w2t_ref, b2_ref,
                    out_ref, h_all_ref, *, activation: str, matmul_dtype):
    """Whole forward pass in one invocation.

    x_ref    : (B, T, E)       word embeddings (batch-major, as produced by the gather)
    w1t_ref  : (E, H)          linear1 weight, pre-transposed
    b1c_ref  : (1, H)          combined bias b1 + bh (folded in the wrapper)
    wht_ref  : (H, H)          linear_hidden weight, pre-transposed
    w2t_ref  : (H, Tg_pad)     linear2 weight, pre-transposed + zero-padded lane-dense
    b2_ref   : (1, Tg_pad)
    out_ref  : (B, T, Tg_pad)  tag scores (padded lanes sliced off in the wrapper)
    h_all_ref: (B, T, H)       VMEM scratch holding every hidden state
    """
    B, T, E = x_ref.shape
    H = wht_ref.shape[0]

    # ---- hoisted input projection: one batched matmul over all (b, t) pairs ----
    x_flat = x_ref[...].reshape(B * T, E).astype(matmul_dtype)
    x1 = (jnp.dot(x_flat, w1t_ref[...].astype(matmul_dtype),
                  preferred_element_type=jnp.float32)
          + b1c_ref[...])                                  # (B*T, H), f32, both biases folded in
    x1 = x1.reshape(B, T, H)

    wht = wht_ref[...].astype(matmul_dtype)                # hoisted load + cast

    # ---- serial recurrence (only the HxH matmul + activation per step) ----
    h = jnp.zeros((B, H), jnp.float32)
    for t in range(T):                                     # static T -> unrolled at trace time
        pre = x1[:, t, :] + jnp.dot(h.astype(matmul_dtype), wht,
                                    preferred_element_type=jnp.float32)
        if activation == "tanh":
            h = jnp.tanh(pre)
        else:  # "relu"
            h = jnp.maximum(pre, 0.0)
        h_all_ref[:, t, :] = h

    # ---- hoisted output projection: one batched, lane-dense matmul ----
    h_all = h_all_ref[...].reshape(B * T, H).astype(matmul_dtype)
    tag = (jnp.dot(h_all, w2t_ref[...].astype(matmul_dtype),
                   preferred_element_type=jnp.float32)
           + b2_ref[...])                                  # (B*T, Tg_pad), f32
    out_ref[...] = tag.reshape(B, T, -1).astype(out_ref.dtype)


def tagging_model_forward(sentences, params, *, activation: str = "tanh",
                          matmul_dtype=jnp.float32):
    """Forward pass matching TaggingModel.forward.

    sentences : (batch, seq_len) int32 token ids
    returns   : (batch, seq_len, tagset_size) float32
    """
    emb_table = params["embedding"]          # (vocab, E)
    w1, b1 = params["w1"], params["b1"]      # (H, E), (H,)
    wh, bh = params["wh"], params["bh"]      # (H, H), (H,)
    w2, b2 = params["w2"], params["b2"]      # (Tg, H), (Tg,)

    B, T = sentences.shape
    E = emb_table.shape[1]
    H = w1.shape[0]
    Tg = w2.shape[0]
    Tg_pad = ((Tg + 127) // 128) * 128       # lane-dense output last dim

    # Glue: embedding lookup (kept batch-major; no activation transposes needed).
    embeds = jnp.take(emb_table, sentences, axis=0)        # (B, T, E)

    # Glue: pre-transpose weights, fold b1+bh into a single bias, 2-D biases,
    # zero-pad the output projection to Tg_pad.
    w1t = w1.T                                             # (E, H)
    wht = wh.T                                             # (H, H)
    w2t_pad = jnp.zeros((H, Tg_pad), jnp.float32).at[:, :Tg].set(w2.T)
    b1c_2d = (b1 + bh).reshape(1, H)                       # folded bias
    b2_pad = jnp.zeros((1, Tg_pad), jnp.float32).at[:, :Tg].set(b2.reshape(1, Tg))

    kernel = functools.partial(_tagging_kernel, activation=activation,
                               matmul_dtype=matmul_dtype)

    out_pad = pl.pallas_call(
        kernel,
        out_shape=jax.ShapeDtypeStruct((B, T, Tg_pad), jnp.float32),
        grid_spec=pltpu.PrefetchScalarGridSpec(
            num_scalar_prefetch=0,
            grid=(1,),                                     # single invocation
            in_specs=[
                pl.BlockSpec((B, T, E), lambda i: (0, 0, 0)),   # embeds
                pl.BlockSpec((E, H), lambda i: (0, 0)),         # w1t
                pl.BlockSpec((1, H), lambda i: (0, 0)),         # b1 + bh
                pl.BlockSpec((H, H), lambda i: (0, 0)),         # wht
                pl.BlockSpec((H, Tg_pad), lambda i: (0, 0)),    # w2t (padded)
                pl.BlockSpec((1, Tg_pad), lambda i: (0, 0)),    # b2  (padded)
            ],
            out_specs=pl.BlockSpec((B, T, Tg_pad), lambda i: (0, 0, 0)),
            scratch_shapes=[pltpu.VMEM((B, T, H), jnp.float32)],   # hidden-state history
        ),
        compiler_params=pltpu.CompilerParams(
            dimension_semantics=("arbitrary",),
        ),
    )(embeds, w1t, b1c_2d, wht, w2t_pad, b2_pad)

    return out_pad[:, :, :Tg]                              # (B, T, Tg)


def _init_params(key, vocab_size, tagset_size, embedding_dim, hidden_dim):
    """Deterministic parameter init mirroring the PyTorch module's shapes."""
    ks = jax.random.split(key, 7)

    def uniform(k, shape, fan_in):
        bound = 1.0 / jnp.sqrt(jnp.float32(fan_in))
        return jax.random.uniform(k, shape, jnp.float32, -bound, bound)

    return {
        # nn.Embedding default init is N(0,1)
        "embedding": jax.random.normal(ks[0], (vocab_size, embedding_dim), jnp.float32),
        "w1": uniform(ks[1], (hidden_dim, embedding_dim), embedding_dim),
        "b1": uniform(ks[2], (hidden_dim,), embedding_dim),
        "wh": uniform(ks[3], (hidden_dim, hidden_dim), hidden_dim),
        "bh": uniform(ks[4], (hidden_dim,), hidden_dim),
        "w2": uniform(ks[5], (tagset_size, hidden_dim), hidden_dim),
        "b2": uniform(ks[6], (tagset_size,), hidden_dim),
    }


def _reference_forward(sentences, params, activation="tanh"):
    """Plain-JAX reference replicating the PyTorch forward, for a sanity check."""
    emb = jnp.take(params["embedding"], sentences, axis=0)    # (B, T, E)
    B, T, _ = emb.shape
    H = params["w1"].shape[0]
    h = jnp.zeros((B, H), jnp.float32)
    act = jnp.tanh if activation == "tanh" else (lambda v: jnp.maximum(v, 0.0))
    outs = []
    for t in range(T):
        x = emb[:, t, :]
        pre = (x @ params["w1"].T + params["b1"]
               + h @ params["wh"].T + params["bh"])
        h = act(pre)
        outs.append(h @ params["w2"].T + params["b2"])
    return jnp.stack(outs, axis=1)                            # (B, T, Tg)


if __name__ == "__main__":
    vocab_size = 50
    tagset_size = 8
    embedding_dim = 16
    hidden_dim = 32
    batch = 2
    seq_len = 8

    key = jax.random.PRNGKey(0)
    pkey, skey = jax.random.split(key)
    params = _init_params(pkey, vocab_size, tagset_size, embedding_dim, hidden_dim)
    sentences = jax.random.randint(skey, (batch, seq_len), 0, vocab_size, jnp.int32)

    ok = True
    for activation in ("tanh", "relu"):
        out = tagging_model_forward(sentences, params, activation=activation)
        out = jax.block_until_ready(out)
        ref = _reference_forward(sentences, params, activation=activation)
        ok &= out.shape == (batch, seq_len, tagset_size)
        ok &= bool(jnp.allclose(out, ref, atol=1e-4, rtol=1e-4))

    assert ok
    print("KERNEL_OK")
</pallas_src>

<mosaic_0001>
module attributes {stable_mosaic.version = 11 : i64} {
  func.func @_tagging_kernel(%arg0: i32, %arg1: memref<2x8x16xf32, #tpu.memory_space<vmem>>, %arg2: memref<16x32xf32, #tpu.memory_space<vmem>>, %arg3: memref<1x32xf32, #tpu.memory_space<vmem>>, %arg4: memref<32x32xf32, #tpu.memory_space<vmem>>, %arg5: memref<32x128xf32, #tpu.memory_space<vmem>>, %arg6: memref<1x128xf32, #tpu.memory_space<vmem>>, %arg7: memref<2x8x128xf32, #tpu.memory_space<vmem>>, %arg8: memref<2x8x32xf32, #tpu.memory_space<vmem>>) attributes {dimension_semantics = [#tpu.dimension_semantics<arbitrary>], iteration_bounds = array<i64: 1>, scalar_prefetch = 0 : i64, scratch_operands = 1 : i64, tpu.core_type = #tpu.core_type<tc>, window_params = [{pipeline_mode = #tpu.pipeline_mode<synchronous>, transform_indices = @transform_0, window_bounds = array<i64: 2, 8, 16>}, {pipeline_mode = #tpu.pipeline_mode<synchronous>, transform_indices = @transform_1, window_bounds = array<i64: 16, 32>}, {pipeline_mode = #tpu.pipeline_mode<synchronous>, transform_indices = @transform_2, window_bounds = array<i64: 1, 32>}, {pipeline_mode = #tpu.pipeline_mode<synchronous>, transform_indices = @transform_3, window_bounds = array<i64: 32, 32>}, {pipeline_mode = #tpu.pipeline_mode<synchronous>, transform_indices = @transform_4, window_bounds = array<i64: 32, 128>}, {pipeline_mode = #tpu.pipeline_mode<synchronous>, transform_indices = @transform_5, window_bounds = array<i64: 1, 128>}, {pipeline_mode = #tpu.pipeline_mode<synchronous>, transform_indices = @transform_6, window_bounds = array<i64: 2, 8, 128>}]} {
    %c0 = arith.constant 0 : index
    %c0_0 = arith.constant 0 : index
    %c0_1 = arith.constant 0 : index
    %0 = vector.load %arg1[%c0, %c0_0, %c0_1] : memref<2x8x16xf32, #tpu.memory_space<vmem>>, vector<2x8x16xf32>
    %1 = vector.shape_cast %0 : vector<2x8x16xf32> to vector<16x16xf32>
    %c0_2 = arith.constant 0 : index
    %c0_3 = arith.constant 0 : index
    %2 = vector.load %arg2[%c0_2, %c0_3] : memref<16x32xf32, #tpu.memory_space<vmem>>, vector<16x32xf32>
    %cst = arith.constant dense<0.000000e+00> : vector<16x32xf32>
    %3 = tpu.matmul %1, %2, %cst {dimension_numbers = #tpu.dot_dimension_numbers<[1], [0], [0], [1], [0, 0, 1, 1], [], []>} : vector<16x16xf32>, vector<16x32xf32>, vector<16x32xf32> -> vector<16x32xf32>
    %c0_4 = arith.constant 0 : index
    %c0_5 = arith.constant 0 : index
    %4 = vector.load %arg3[%c0_4, %c0_5] : memref<1x32xf32, #tpu.memory_space<vmem>>, vector<1x32xf32>
    %5 = vector.broadcast %4 : vector<1x32xf32> to vector<16x32xf32>
    %6 = arith.addf %3, %5 : vector<16x32xf32>
    %7 = vector.shape_cast %6 : vector<16x32xf32> to vector<2x8x32xf32>
    %c0_6 = arith.constant 0 : index
    %c0_7 = arith.constant 0 : index
    %8 = vector.load %arg4[%c0_6, %c0_7] : memref<32x32xf32, #tpu.memory_space<vmem>>, vector<32x32xf32>
    %cst_8 = arith.constant 0.000000e+00 : f32
    %9 = vector.broadcast %cst_8 : f32 to vector<2x32xf32>
    %10 = vector.extract_strided_slice %7 {offsets = [0, 0, 0], sizes = [2, 1, 32], strides = [1, 1, 1]} : vector<2x8x32xf32> to vector<2x1x32xf32>
    %11 = vector.shape_cast %10 : vector<2x1x32xf32> to vector<2x32xf32>
    %cst_9 = arith.constant dense<0.000000e+00> : vector<2x32xf32>
    %12 = tpu.matmul %9, %8, %cst_9 {dimension_numbers = #tpu.dot_dimension_numbers<[1], [0], [0], [1], [0, 0, 1, 1], [], []>} : vector<2x32xf32>, vector<32x32xf32>, vector<2x32xf32> -> vector<2x32xf32>
    %13 = arith.addf %11, %12 : vector<2x32xf32>
    %14 = math.tanh %13 : vector<2x32xf32>
    %c0_10 = arith.constant 0 : index
    %c0_11 = arith.constant 0 : index
    %c0_12 = arith.constant 0 : index
    %15 = vector.load %arg8[%c0_10, %c0_11, %c0_12] : memref<2x8x32xf32, #tpu.memory_space<vmem>>, vector<2x1x32xf32>
    %16 = vector.shape_cast %15 : vector<2x1x32xf32> to vector<2x32xf32>
    %17 = vector.shape_cast %14 : vector<2x32xf32> to vector<2x1x32xf32>
    tpu.vector_store %arg8[%c0_10, %c0_11, %c0_12], %17 {strides = array<i32>} : memref<2x8x32xf32, #tpu.memory_space<vmem>>, vector<2x1x32xf32>,
    %18 = vector.extract_strided_slice %7 {offsets = [0, 1, 0], sizes = [2, 1, 32], strides = [1, 1, 1]} : vector<2x8x32xf32> to vector<2x1x32xf32>
    %19 = vector.shape_cast %18 : vector<2x1x32xf32> to vector<2x32xf32>
    %cst_13 = arith.constant dense<0.000000e+00> : vector<2x32xf32>
    %20 = tpu.matmul %14, %8, %cst_13 {dimension_numbers = #tpu.dot_dimension_numbers<[1], [0], [0], [1], [0, 0, 1, 1], [], []>} : vector<2x32xf32>, vector<32x32xf32>, vector<2x32xf32> -> vector<2x32xf32>
    %21 = arith.addf %19, %20 : vector<2x32xf32>
    %22 = math.tanh %21 : vector<2x32xf32>
    %c0_14 = arith.constant 0 : index
    %c1 = arith.constant 1 : index
    %c0_15 = arith.constant 0 : index
    %23 = vector.load %arg8[%c0_14, %c1, %c0_15] : memref<2x8x32xf32, #tpu.memory_space<vmem>>, vector<2x1x32xf32>
    %24 = vector.shape_cast %23 : vector<2x1x32xf32> to vector<2x32xf32>
    %25 = vector.shape_cast %22 : vector<2x32xf32> to vector<2x1x32xf32>
    tpu.vector_store %arg8[%c0_14, %c1, %c0_15], %25 {strides = array<i32>} : memref<2x8x32xf32, #tpu.memory_space<vmem>>, vector<2x1x32xf32>,
    %26 = vector.extract_strided_slice %7 {offsets = [0, 2, 0], sizes = [2, 1, 32], strides = [1, 1, 1]} : vector<2x8x32xf32> to vector<2x1x32xf32>
    %27 = vector.shape_cast %26 : vector<2x1x32xf32> to vector<2x32xf32>
    %cst_16 = arith.constant dense<0.000000e+00> : vector<2x32xf32>
    %28 = tpu.matmul %22, %8, %cst_16 {dimension_numbers = #tpu.dot_dimension_numbers<[1], [0], [0], [1], [0, 0, 1, 1], [], []>} : vector<2x32xf32>, vector<32x32xf32>, vector<2x32xf32> -> vector<2x32xf32>
    %29 = arith.addf %27, %28 : vector<2x32xf32>
    %30 = math.tanh %29 : vector<2x32xf32>
    %c0_17 = arith.constant 0 : index
    %c2 = arith.constant 2 : index
    %c0_18 = arith.constant 0 : index
    %31 = vector.load %arg8[%c0_17, %c2, %c0_18] : memref<2x8x32xf32, #tpu.memory_space<vmem>>, vector<2x1x32xf32>
    %32 = vector.shape_cast %31 : vector<2x1x32xf32> to vector<2x32xf32>
    %33 = vector.shape_cast %30 : vector<2x32xf32> to vector<2x1x32xf32>
    tpu.vector_store %arg8[%c0_17, %c2, %c0_18], %33 {strides = array<i32>} : memref<2x8x32xf32, #tpu.memory_space<vmem>>, vector<2x1x32xf32>,
    %34 = vector.extract_strided_slice %7 {offsets = [0, 3, 0], sizes = [2, 1, 32], strides = [1, 1, 1]} : vector<2x8x32xf32> to vector<2x1x32xf32>
    %35 = vector.shape_cast %34 : vector<2x1x32xf32> to vector<2x32xf32>
    %cst_19 = arith.constant dense<0.000000e+00> : vector<2x32xf32>
    %36 = tpu.matmul %30, %8, %cst_19 {dimension_numbers = #tpu.dot_dimension_numbers<[1], [0], [0], [1], [0, 0, 1, 1], [], []>} : vector<2x32xf32>, vector<32x32xf32>, vector<2x32xf32> -> vector<2x32xf32>
    %37 = arith.addf %35, %36 : vector<2x32xf32>
    %38 = math.tanh %37 : vector<2x32xf32>
    %c0_20 = arith.constant 0 : index
    %c3 = arith.constant 3 : index
    %c0_21 = arith.constant 0 : index
    %39 = vector.load %arg8[%c0_20, %c3, %c0_21] : memref<2x8x32xf32, #tpu.memory_space<vmem>>, vector<2x1x32xf32>
    %40 = vector.shape_cast %39 : vector<2x1x32xf32> to vector<2x32xf32>
    %41 = vector.shape_cast %38 : vector<2x32xf32> to vector<2x1x32xf32>
    tpu.vector_store %arg8[%c0_20, %c3, %c0_21], %41 {strides = array<i32>} : memref<2x8x32xf32, #tpu.memory_space<vmem>>, vector<2x1x32xf32>,
    %42 = vector.extract_strided_slice %7 {offsets = [0, 4, 0], sizes = [2, 1, 32], strides = [1, 1, 1]} : vector<2x8x32xf32> to vector<2x1x32xf32>
    %43 = vector.shape_cast %42 : vector<2x1x32xf32> to vector<2x32xf32>
    %cst_22 = arith.constant dense<0.000000e+00> : vector<2x32xf32>
    %44 = tpu.matmul %38, %8, %cst_22 {dimension_numbers = #tpu.dot_dimension_numbers<[1], [0], [0], [1], [0, 0, 1, 1], [], []>} : vector<2x32xf32>, vector<32x32xf32>, vector<2x32xf32> -> vector<2x32xf32>
    %45 = arith.addf %43, %44 : vector<2x32xf32>
    %46 = math.tanh %45 : vector<2x32xf32>
    %c0_23 = arith.constant 0 : index
    %c4 = arith.constant 4 : index
    %c0_24 = arith.constant 0 : index
    %47 = vector.load %arg8[%c0_23, %c4, %c0_24] : memref<2x8x32xf32, #tpu.memory_space<vmem>>, vector<2x1x32xf32>
    %48 = vector.shape_cast %47 : vector<2x1x32xf32> to vector<2x32xf32>
    %49 = vector.shape_cast %46 : vector<2x32xf32> to vector<2x1x32xf32>
    tpu.vector_store %arg8[%c0_23, %c4, %c0_24], %49 {strides = array<i32>} : memref<2x8x32xf32, #tpu.memory_space<vmem>>, vector<2x1x32xf32>,
    %50 = vector.extract_strided_slice %7 {offsets = [0, 5, 0], sizes = [2, 1, 32], strides = [1, 1, 1]} : vector<2x8x32xf32> to vector<2x1x32xf32>
    %51 = vector.shape_cast %50 : vector<2x1x32xf32> to vector<2x32xf32>
    %cst_25 = arith.constant dense<0.000000e+00> : vector<2x32xf32>
    %52 = tpu.matmul %46, %8, %cst_25 {dimension_numbers = #tpu.dot_dimension_numbers<[1], [0], [0], [1], [0, 0, 1, 1], [], []>} : vector<2x32xf32>, vector<32x32xf32>, vector<2x32xf32> -> vector<2x32xf32>
    %53 = arith.addf %51, %52 : vector<2x32xf32>
    %54 = math.tanh %53 : vector<2x32xf32>
    %c0_26 = arith.constant 0 : index
    %c5 = arith.constant 5 : index
    %c0_27 = arith.constant 0 : index
    %55 = vector.load %arg8[%c0_26, %c5, %c0_27] : memref<2x8x32xf32, #tpu.memory_space<vmem>>, vector<2x1x32xf32>
    %56 = vector.shape_cast %55 : vector<2x1x32xf32> to vector<2x32xf32>
    %57 = vector.shape_cast %54 : vector<2x32xf32> to vector<2x1x32xf32>
    tpu.vector_store %arg8[%c0_26, %c5, %c0_27], %57 {strides = array<i32>} : memref<2x8x32xf32, #tpu.memory_space<vmem>>, vector<2x1x32xf32>,
    %58 = vector.extract_strided_slice %7 {offsets = [0, 6, 0], sizes = [2, 1, 32], strides = [1, 1, 1]} : vector<2x8x32xf32> to vector<2x1x32xf32>
    %59 = vector.shape_cast %58 : vector<2x1x32xf32> to vector<2x32xf32>
    %cst_28 = arith.constant dense<0.000000e+00> : vector<2x32xf32>
    %60 = tpu.matmul %54, %8, %cst_28 {dimension_numbers = #tpu.dot_dimension_numbers<[1], [0], [0], [1], [0, 0, 1, 1], [], []>} : vector<2x32xf32>, vector<32x32xf32>, vector<2x32xf32> -> vector<2x32xf32>
    %61 = arith.addf %59, %60 : vector<2x32xf32>
    %62 = math.tanh %61 : vector<2x32xf32>
    %c0_29 = arith.constant 0 : index
    %c6 = arith.constant 6 : index
    %c0_30 = arith.constant 0 : index
    %63 = vector.load %arg8[%c0_29, %c6, %c0_30] : memref<2x8x32xf32, #tpu.memory_space<vmem>>, vector<2x1x32xf32>
    %64 = vector.shape_cast %63 : vector<2x1x32xf32> to vector<2x32xf32>
    %65 = vector.shape_cast %62 : vector<2x32xf32> to vector<2x1x32xf32>
    tpu.vector_store %arg8[%c0_29, %c6, %c0_30], %65 {strides = array<i32>} : memref<2x8x32xf32, #tpu.memory_space<vmem>>, vector<2x1x32xf32>,
    %66 = vector.extract_strided_slice %7 {offsets = [0, 7, 0], sizes = [2, 1, 32], strides = [1, 1, 1]} : vector<2x8x32xf32> to vector<2x1x32xf32>
    %67 = vector.shape_cast %66 : vector<2x1x32xf32> to vector<2x32xf32>
    %cst_31 = arith.constant dense<0.000000e+00> : vector<2x32xf32>
    %68 = tpu.matmul %62, %8, %cst_31 {dimension_numbers = #tpu.dot_dimension_numbers<[1], [0], [0], [1], [0, 0, 1, 1], [], []>} : vector<2x32xf32>, vector<32x32xf32>, vector<2x32xf32> -> vector<2x32xf32>
    %69 = arith.addf %67, %68 : vector<2x32xf32>
    %70 = math.tanh %69 : vector<2x32xf32>
    %c0_32 = arith.constant 0 : index
    %c7 = arith.constant 7 : index
    %c0_33 = arith.constant 0 : index
    %71 = vector.load %arg8[%c0_32, %c7, %c0_33] : memref<2x8x32xf32, #tpu.memory_space<vmem>>, vector<2x1x32xf32>
    %72 = vector.shape_cast %71 : vector<2x1x32xf32> to vector<2x32xf32>
    %73 = vector.shape_cast %70 : vector<2x32xf32> to vector<2x1x32xf32>
    tpu.vector_store %arg8[%c0_32, %c7, %c0_33], %73 {strides = array<i32>} : memref<2x8x32xf32, #tpu.memory_space<vmem>>, vector<2x1x32xf32>,
    %c0_34 = arith.constant 0 : index
    %c0_35 = arith.constant 0 : index
    %c0_36 = arith.constant 0 : index
    %74 = vector.load %arg8[%c0_34, %c0_35, %c0_36] : memref<2x8x32xf32, #tpu.memory_space<vmem>>, vector<2x8x32xf32>
    %75 = vector.shape_cast %74 : vector<2x8x32xf32> to vector<16x32xf32>
    %c0_37 = arith.constant 0 : index
    %c0_38 = arith.constant 0 : index
    %76 = vector.load %arg5[%c0_37, %c0_38] : memref<32x128xf32, #tpu.memory_space<vmem>>, vector<32x128xf32>
    %cst_39 = arith.constant dense<0.000000e+00> : vector<16x128xf32>
    %77 = tpu.matmul %75, %76, %cst_39 {dimension_numbers = #tpu.dot_dimension_numbers<[1], [0], [0], [1], [0, 0, 1, 1], [], []>} : vector<16x32xf32>, vector<32x128xf32>, vector<16x128xf32> -> vector<16x128xf32>
    %c0_40 = arith.constant 0 : index
    %c0_41 = arith.constant 0 : index
    %78 = vector.load %arg6[%c0_40, %c0_41] : memref<1x128xf32, #tpu.memory_space<vmem>>, vector<1x128xf32>
    %79 = vector.broadcast %78 : vector<1x128xf32> to vector<16x128xf32>
    %80 = arith.addf %77, %79 : vector<16x128xf32>
    %81 = vector.shape_cast %80 : vector<16x128xf32> to vector<2x8x128xf32>
    %c0_42 = arith.constant 0 : index
    %c0_43 = arith.constant 0 : index
    %c0_44 = arith.constant 0 : index
    %82 = vector.load %arg7[%c0_42, %c0_43, %c0_44] : memref<2x8x128xf32, #tpu.memory_space<vmem>>, vector<2x8x128xf32>
    tpu.vector_store %arg7[%c0_42, %c0_43, %c0_44], %81 {strides = array<i32>} : memref<2x8x128xf32, #tpu.memory_space<vmem>>, vector<2x8x128xf32>,
    return
  }
  func.func @transform_0(%arg0: i32) -> (i32, i32, i32) {
    %c0_i32 = arith.constant 0 : i32
    %c0_i32_0 = arith.constant 0 : i32
    %c0_i32_1 = arith.constant 0 : i32
    %c0_i32_2 = arith.constant 0 : i32
    return %c0_i32, %c0_i32_0, %c0_i32_1 : i32, i32, i32
  }
  func.func @transform_1(%arg0: i32) -> (i32, i32) {
    %c0_i32 = arith.constant 0 : i32
    %c0_i32_0 = arith.constant 0 : i32
    %c0_i32_1 = arith.constant 0 : i32
    return %c0_i32, %c0_i32_0 : i32, i32
  }
  func.func @transform_2(%arg0: i32) -> (i32, i32) {
    %c0_i32 = arith.constant 0 : i32
    %c0_i32_0 = arith.constant 0 : i32
    %c0_i32_1 = arith.constant 0 : i32
    return %c0_i32, %c0_i32_0 : i32, i32
  }
  func.func @transform_3(%arg0: i32) -> (i32, i32) {
    %c0_i32 = arith.constant 0 : i32
    %c0_i32_0 = arith.constant 0 : i32
    %c0_i32_1 = arith.constant 0 : i32
    return %c0_i32, %c0_i32_0 : i32, i32
  }
  func.func @transform_4(%arg0: i32) -> (i32, i32) {
    %c0_i32 = arith.constant 0 : i32
    %c0_i32_0 = arith.constant 0 : i32
    %c0_i32_1 = arith.constant 0 : i32
    return %c0_i32, %c0_i32_0 : i32, i32
  }
  func.func @transform_5(%arg0: i32) -> (i32, i32) {
    %c0_i32 = arith.constant 0 : i32
    %c0_i32_0 = arith.constant 0 : i32
    %c0_i32_1 = arith.constant 0 : i32
    return %c0_i32, %c0_i32_0 : i32, i32
  }
  func.func @transform_6(%arg0: i32) -> (i32, i32, i32) {
    %c0_i32 = arith.constant 0 : i32
    %c0_i32_0 = arith.constant 0 : i32
    %c0_i32_1 = arith.constant 0 : i32
    %c0_i32_2 = arith.constant 0 : i32
    return %c0_i32, %c0_i32_0, %c0_i32_1 : i32, i32, i32
  }
}

</mosaic_0001>

<bundles_post_ra>
// kernel: tpu_custom_call.1
= control target key start
LH: loop header
LB: loop body
LE: loop exit
PB: predicated region body
PF: predicated region fallthrough
CT: control target
= control target key end

     0   :  { %11 = vsyncpa [#allocation4], 0  ;;  %s1617_s0 = inlined_call_operand.hbm [shape: f32[2,8,16], index: 0, kind: input, shape index: {}]   ;;  %s1618_s1 = inlined_call_operand.hbm [shape: f32[16,32], index: 1, kind: input, shape index: {}]   ;;  %s1619_s2 = inlined_call_operand.vmem [shape: f32[1,32], index: 2, kind: input, shape index: {}]   ;;  %s1620_s3 = inlined_call_operand.hbm [shape: f32[32,32], index: 3, kind: input, shape index: {}]   ;;  %s1621_s4 = inlined_call_operand.hbm [shape: f32[32,128], index: 4, kind: input, shape index: {}]   ;;  %s1622_s5 = inlined_call_operand.vmem [shape: f32[1,128], index: 5, kind: input, shape index: {}]   ;;  %s1623_s6 = inlined_call_operand.hbm [shape: f32[2,8,128], index: 6, kind: output, shape index: {}]  }
   0x1   :  { %12 = vsyncpa [#allocation7], 0 }
   0x2   :  { %13 = vsyncpa [#allocation10], 0 }
   0x3   :  { %14 = vsyncpa [#allocation5], 0  ;;  %s1386_s21 = smov [#allocation6]   ;;  %s1387_s23 = smov [#allocation3]  }
   0x4   :  { %s32_s22 = sshll.u32 %s1386_s21, 4  ;;  %s20_s24 = sshll.u32 %s1387_s23, 4  ;;  %s33_s22 = int_to_ptr.vmem [resolvable:$true] %s32_s22  ;;  %s1431_s24 = int_to_ptr.vmem [resolvable:$true] %s20_s24 }
   0x5   :  { %s1268_s27 = scalar_lea.hbm %s1618_s1, 256 }
   0x6   :  { %p1269_p0 = scmp.ne.s32.totalorder %s1618_s1, %s1268_s27  ;;  %p1272_p1 = scmp.lt.u32.totalorder %s1268_s27, %s1618_s1 }
   0x8   :  { %p1274_p2 = pnand %p1272_p1, %p1269_p0 }
   0xa   :  { %1277 = shalt.err (!%p1274_p2)
}
   0xb   :  { %s1278_s8 = scalar_lea.vmem %s33_s22, 256  ;;  %p1283_p4 = scmp.lt.s32.totalorder %s33_s22, %s33_s22 }
   0xc   :  { %p1279_p3 = scmp.ne.s32.totalorder %s33_s22, %s1278_s8  ;;  %p1284_p5 = scmp.lt.s32.totalorder %s1278_s8, %s1278_s8 }
   0xe   :  { %p1285_p6 = por %p1284_p5, %p1283_p4 }
  0x10   :  { %p1286_p7 = pnand %p1285_p6, %p1279_p3 }
  0x12   :  { %1289 = shalt.err (!%p1286_p7)
}
  0x13   :  { %s1388_s9 = smov 128   ;;  %s1389_s10 = smov 8  }
  0x14   :  { %38 = dma.hbm_to_vmem [thread:$0]  %s1618_s1, 256, %s33_s22, [#allocation7], %s1388_s9, %s1388_s9, %s1389_s10  }
  0x15   :  { %s1290_s15 = scalar_lea.hbm %s1617_s0, 256 }
  0x16   :  { %p1291_p8 = scmp.ne.s32.totalorder %s1617_s0, %s1290_s15  ;;  %p1294_p9 = scmp.lt.u32.totalorder %s1290_s15, %s1617_s0 }
  0x18   :  { %p1296_p10 = pnand %p1294_p9, %p1291_p8 }
  0x1a   :  { %1299 = shalt.err (!%p1296_p10)
}
  0x1b   :  { %s1300_s20 = scalar_lea.vmem %s1431_s24, 256  ;;  %p1305_p12 = scmp.lt.s32.totalorder %s1431_s24, %s1431_s24 }
  0x1c   :  { %p1301_p11 = scmp.ne.s32.totalorder %s1431_s24, %s1300_s20  ;;  %p1306_p13 = scmp.lt.s32.totalorder %s1300_s20, %s1300_s20 }
  0x1e   :  { %p1307_p0 = por %p1306_p13, %p1305_p12 }
  0x20   :  { %p1308_p1 = pnand %p1307_p0, %p1301_p11 }
  0x22   :  { %1311 = shalt.err (!%p1308_p1)
}
  0x23   :  { %26 = dma.hbm_to_vmem [thread:$0]  %s1617_s0, 256, %s1431_s24, [#allocation4], %s1388_s9, %s1388_s9, %s1389_s10  }
  0x24   :  { %s1390_s22 = smov [#allocation8]   ;;  %s1391_s25 = smov [#allocation9]  }
  0x25   :  { %s46_s23 = sshll.u32 %s1390_s22, 4  ;;  %s58_s26 = sshll.u32 %s1391_s25, 4  ;;  %s47_s23 = int_to_ptr.vmem [resolvable:$true] %s46_s23  ;;  %s1468_s26 = int_to_ptr.vmem [resolvable:$true] %s58_s26 }
  0x26   :  { %s1312_s29 = scalar_lea.hbm %s1620_s3, 512 }
  0x27   :  { %p1313_p2 = scmp.ne.s32.totalorder %s1620_s3, %s1312_s29  ;;  %p1316_p3 = scmp.lt.u32.totalorder %s1312_s29, %s1620_s3 }
  0x29   :  { %p1318_p4 = pnand %p1316_p3, %p1313_p2 }
  0x2b   :  { %1321 = shalt.err (!%p1318_p4)
}
  0x2c   :  { %s1322_s0 = scalar_lea.vmem %s47_s23, 512  ;;  %p1327_p6 = scmp.lt.s32.totalorder %s47_s23, %s47_s23 }
  0x2d   :  { %p1323_p5 = scmp.ne.s32.totalorder %s47_s23, %s1322_s0  ;;  %p1328_p7 = scmp.lt.s32.totalorder %s1322_s0, %s1322_s0 }
  0x2f   :  { %p1329_p8 = por %p1328_p7, %p1327_p6 }
  0x31   :  { %p1330_p9 = pnand %p1329_p8, %p1323_p5 }
  0x33   :  { %1333 = shalt.err (!%p1330_p9)
}
  0x34   :  { %52 = dma.hbm_to_vmem [thread:$0]  %s1620_s3, 512, %s47_s23, [#allocation7], %s1388_s9, %s1388_s9, %s1389_s10  }
  0x35   :  { %s1334_s15 = scalar_lea.hbm %s1621_s4, 512 }
  0x36   :  { %p1335_p10 = scmp.ne.s32.totalorder %s1621_s4, %s1334_s15  ;;  %p1338_p11 = scmp.lt.u32.totalorder %s1334_s15, %s1621_s4 }
  0x38   :  { %p1340_p12 = pnand %p1338_p11, %p1335_p10 }
  0x3a   :  { %1343 = shalt.err (!%p1340_p12)
}
  0x3b   :  { %s1344_s20 = scalar_lea.vmem %s1468_s26, 512  ;;  %p1349_p0 = scmp.lt.s32.totalorder %s1468_s26, %s1468_s26 }
  0x3c   :  { %p1345_p13 = scmp.ne.s32.totalorder %s1468_s26, %s1344_s20  ;;  %p1350_p1 = scmp.lt.s32.totalorder %s1344_s20, %s1344_s20 }
  0x3e   :  { %p1351_p2 = por %p1350_p1, %p1349_p0 }
  0x40   :  { %p1352_p3 = pnand %p1351_p2, %p1345_p13 }
  0x42   :  { %1355 = shalt.err (!%p1352_p3)
}
  0x43   :  { %64 = dma.hbm_to_vmem [thread:$0]  %s1621_s4, 512, %s1468_s26, [#allocation10], %s1388_s9, %s1388_s9, %s1389_s10  }
  0x44   :  { %1378 = dma.done.wait [#allocation4], 256  }
  0x45   :  { %1379 = vsyncadd [#allocation4], 4294967040 }
  0x46   :  { %1380 = dma.done.wait [#allocation7], 768  }
  0x47   :  { %1381 = vsyncadd [#allocation7], 4294966528 }
  0x48   :  { %1382 = dma.done.wait [#allocation10], 512  }
  0x49   :  { %1383 = vsyncadd [#allocation10], 4294966784  ;;  %v1392_v0 = vmov 0.0|0.0   ;;  %vm1393_vm0 = vmmov 0   ;;  %v1394_v1 = vmov 0.0   ;;  %vm90_vm1 = vcmask 130048  }
  0x4a   :  { %1170 = vmatprep.subr.bf16.mxu1 %v1392_v0  ;;  %1075 = vmatprep.mubr.msk.f32.mxu1 %vm1393_vm0, %v1394_v1  ;;  %v81_v2 = vld [vmem:[#allocation6] sm:$0xff]  ;;  %v82_v3 = vld [vmem:[#allocation6 + $0x8] sm:$0xff]  ;;  %v172_v4 = vld [vmem:[#allocation8] sm:$0xff]  ;;  %vm258_vm2 = vcmask 253952   ;;  %vm264_vm3 = vcmask 1041409   ;;  %vm176_vm4 = vcmask 261120  }
  0x4b   :  { %v1166_v5 = vpack.c.bf16 %v82_v3, %v81_v2  ;;  %v173_v6 = vld [vmem:[#allocation8 + $0x8] sm:$0xff]  ;;  %v79_v7 = vld [vmem:[#allocation3] sm:$0xff]  ;;  %v174_v9 = vld [vmem:[#allocation8 + $0x10] sm:$0xff]  ;;  %vm346_vm5 = vcmask 254977   ;;  %vm434_vm6 = vcmask 256002   ;;  %vm523_vm7 = vcmask 257027  }
  0x4c   :  { %v1508_v8 = vpack.c.bf16 %v173_v6, %v172_v4  ;;  %1064 = vmatprep.mubr.msk.f32.mxu0 %vm90_vm1, %v79_v7  ;;  %v175_v10 = vld [vmem:[#allocation8 + $0x18] sm:$0xff]  ;;  %v80_v11 = vld [vmem:[#allocation3 + $0x8] sm:$0xff]  ;;  %v997_v13 = vld [vmem:[%s1619_s2] ss:$0 sm:$0xff]  ;;  %vm612_vm8 = vcmask 258052   ;;  %vm701_vm9 = vcmask 259077  }
  0x4d   :  { %1167 = vmatprep.subr.bf16.mxu0 %v1166_v5  ;;  %v1512_v12 = vpack.c.bf16 %v175_v10, %v174_v9  ;;  %vm790_vm10 = vcmask 260102   ;;  %vm879_vm11 = vcmask 261127   ;;  %s1395_s23 = smov [#allocation11]  }
  0x4e   :  { %1172 = vmatpush3.bf16.msra.mxu1 %v1508_v8  ;;  %1169 = vmatpush3.bf16.msra.mxu0 %v1166_v5  ;;  %s983_s25 = sshll.u32 %s1395_s23, 4  ;;  %s984_s25 = int_to_ptr.vmem [resolvable:$true] %s983_s25 }
  0x4f   :  { %1173 = vmatprep.subr.bf16.mxu1 %v1392_v0  ;;  %1176 = vmatprep.subr.bf16.mxu0 %v1392_v0  ;;  %s1356_s26 = scalar_lea.vmem %s984_s25, 256  ;;  %p1361_p5 = scmp.lt.s32.totalorder %s984_s25, %s984_s25 }
  0x50   :  { %p1357_p4 = scmp.ne.s32.totalorder %s984_s25, %s1356_s26  ;;  %p1362_p6 = scmp.lt.s32.totalorder %s1356_s26, %s1356_s26 }
  0x51   :  { %1065 = vmatmul.mubr.msk.f32.vlgmr.msra.gmra.mrb[0].mxu0 %vm90_vm1, %v80_v11 }
  0x52   :  { %1175 = vmatpush3.bf16.msra.mxu1 %v1512_v12  ;;  %1178 = vmatpush3.bf16.msra.mxu0 %v1508_v8  ;;  %p1363_p7 = por %p1362_p6, %p1361_p5 }
  0x53   :  { %1179 = vmatprep.subr.bf16.mxu0 %v1392_v0  ;;  %1086 = vmatprep.mubr.msk.f32.mxu0 %vm1393_vm0, %v1394_v1 }
  0x54   :  { %1182 = vmatprep.subr.bf16.mxu1 %v1392_v0  ;;  %p1364_p8 = pnand %p1363_p7, %p1357_p4 }
  0x55   :  { %1076 = vmatmul.mubr.f32.vlgmr.msra.gmra.mrb[0].mxu1 %v1394_v1 }
  0x56   :  { %1181 = vmatpush3.bf16.msra.mxu0 %v1512_v12  ;;  %1184 = vmatpush3.bf16.msra.mxu1 %v1508_v8 }
  0x57   :  { %1185 = vmatprep.subr.bf16.mxu1 %v1392_v0  ;;  %1097 = vmatprep.mubr.msk.f32.mxu1 %vm1393_vm0, %v1394_v1 }
  0x58   :  { %1188 = vmatprep.subr.bf16.mxu0 %v1392_v0 }
  0x5a   :  { %1187 = vmatpush3.bf16.msra.mxu1 %v1512_v12 }
  0x5b   :  { %1194 = vmatprep.subr.bf16.mxu1 %v1392_v0 }
 0x124   :  { %v1066_v14 = vpop.f32.mrb[0].mxu0 }
 0x125   :  { %v163_v15 = vpop.f32.mrb[1].mxu0  ;;  %v1537_v17 = vadd.f32 %v1066_v14, %v997_v13 }
 0x126   :  { %v1535_v16 = vadd.f32 %v997_v13, %v163_v15 }
 0x128   :  { %v246_v18 = vpop.f32.mrb[0].mxu1 }
 0x129   :  { %v251_v19 = vrot.slane %v246_v18, 1  ;;  %v254_v20 = vadd.f32 %v246_v18, %v1535_v16  ;;  %v1077_v21 = vpop.f32.mrb[1].mxu1 }
 0x12b   :  { %v255_v22 = vadd.f32 %v251_v19, %v1537_v17  ;;  %1236 = vtanh.f32 %v254_v20 }
 0x12d   :  { %1238 = vtanh.f32 %v255_v22 }
 0x135   :  { %v1237_v23 = vpop.eup %1236 }
 0x136   :  { %259 = vst.msk [vmem:[#allocation2] sm:$0x1] %vm258_vm2, %v1237_v23 }
 0x137   :  { %v1239_v24 = vpop.eup %1238 }
 0x138   :  { %260 = vst.msk [vmem:[#allocation2 + $0x8] sm:$0x1] %vm258_vm2, %v1239_v24  ;;  %v263_v25 = vrot.slane %v1239_v24, 7 }
 0x13a   :  { %v265_v26 = vsel %vm264_vm3, %v263_v25, %v1237_v23 }
 0x13b   :  { %1087 = vmatmul.mubr.msk.f32.vlgmr.msra.gmra.mrb[2].mxu0 %vm176_vm4, %v265_v26 }
 0x13c   :  { %1190 = vmatpush3.bf16.msra.mxu0 %v1508_v8  ;;  %1108 = vmatprep.mubr.msk.f32.mxu0 %vm1393_vm0, %v1394_v1 }
 0x13d   :  { %1191 = vmatprep.subr.bf16.mxu0 %v1392_v0 }
 0x140   :  { %1193 = vmatpush3.bf16.msra.mxu0 %v1512_v12 }
 0x141   :  { %1200 = vmatprep.subr.bf16.mxu0 %v1392_v0 }
 0x20e   :  { %v334_v27 = vpop.f32.mrb[2].mxu0 }
 0x20f   :  { %v339_v28 = vrot.slane %v334_v27, 7  ;;  %v343_v29 = vadd.f32 %v334_v27, %v1537_v17  ;;  %v1088_v30 = vpop.f32.mrb[3].mxu0 }
 0x210   :  { %v885_v30 = vld [vmem:[#allocation9 + $0x8] sm:$0xff] }
 0x211   :  { %v342_v31 = vadd.f32 %v339_v28, %v1535_v16  ;;  %1240 = vtanh.f32 %v343_v29  ;;  %v884_v29 = vld [vmem:[#allocation9] sm:$0xff] }
 0x213   :  { %1242 = vtanh.f32 %v342_v31  ;;  %v1218_v31 = vpack.c.bf16 %v885_v30, %v884_v29 }
 0x21b   :  { %v1241_v32 = vpop.eup %1240 }
 0x21c   :  { %348 = vst.msk [vmem:[#allocation2 + $0x8] sm:$0x2] %vm346_vm5, %v1241_v32 }
 0x21d   :  { %v1243_v33 = vpop.eup %1242 }
 0x21e   :  { %347 = vst.msk [vmem:[#allocation2] sm:$0x2] %vm346_vm5, %v1243_v33  ;;  %v351_v34 = vrot.slane %v1243_v33, 1  ;;  %v887_v33 = vld [vmem:[#allocation9 + $0x18] sm:$0xff] }
 0x220   :  { %v352_v35 = vsel %vm264_vm3, %v1241_v32, %v351_v34  ;;  %v886_v32 = vld [vmem:[#allocation9 + $0x10] sm:$0xff] }
 0x221   :  { %1098 = vmatmul.mubr.msk.f32.vlgmr.msra.gmra.mrb[2].mxu1 %vm176_vm4, %v352_v35  ;;  %v1222_v34 = vpack.c.bf16 %v887_v33, %v886_v32 }
 0x222   :  { %1196 = vmatpush3.bf16.msra.mxu1 %v1508_v8  ;;  %1119 = vmatprep.mubr.msk.f32.mxu1 %vm1393_vm0, %v1394_v1 }
 0x223   :  { %1197 = vmatprep.subr.bf16.mxu1 %v1392_v0 }
 0x226   :  { %1199 = vmatpush3.bf16.msra.mxu1 %v1512_v12 }
 0x227   :  { %1206 = vmatprep.subr.bf16.mxu1 %v1392_v0 }
 0x2f4   :  { %v421_v36 = vpop.f32.mrb[2].mxu1 }
 0x2f5   :  { %v426_v37 = vrot.slane %v421_v36, 6  ;;  %v427_v38 = vrot.slane %v421_v36, 7  ;;  %v1099_v39 = vpop.f32.mrb[3].mxu1 }
 0x2f7   :  { %v430_v40 = vadd.f32 %v426_v37, %v1535_v16  ;;  %v431_v41 = vadd.f32 %v427_v38, %v1537_v17 }
 0x2f9   :  { %1244 = vtanh.f32 %v430_v40 }
 0x2fa   :  { %1246 = vtanh.f32 %v431_v41 }
 0x303   :  { %v1245_v42 = vpop.eup %1244 }
 0x304   :  { %v1247_v43 = vpop.eup %1246  ;;  %435 = vst.msk [vmem:[#allocation2] sm:$0x4] %vm434_vm6, %v1245_v42  ;;  %v439_v44 = vrot.slane %v1245_v42, 2 }
 0x305   :  { %436 = vst.msk [vmem:[#allocation2 + $0x8] sm:$0x4] %vm434_vm6, %v1247_v43  ;;  %v440_v45 = vrot.slane %v1247_v43, 1 }
 0x307   :  { %v441_v46 = vsel %vm264_vm3, %v440_v45, %v439_v44  ;;  %v1007_v45 = vld [vmem:[%s1622_s5] ss:$0 sm:$0xff] }
 0x308   :  { %1109 = vmatmul.mubr.msk.f32.vlgmr.msra.gmra.mrb[4].mxu0 %vm176_vm4, %v441_v46 }
 0x309   :  { %1202 = vmatpush3.bf16.msra.mxu0 %v1508_v8  ;;  %1130 = vmatprep.mubr.msk.f32.mxu0 %vm1393_vm0, %v1394_v1 }
 0x30a   :  { %1203 = vmatprep.subr.bf16.mxu0 %v1392_v0 }
 0x30d   :  { %1205 = vmatpush3.bf16.msra.mxu0 %v1512_v12 }
 0x30e   :  { %1212 = vmatprep.subr.bf16.mxu0 %v1392_v0 }
 0x3db   :  { %v510_v47 = vpop.f32.mrb[4].mxu0 }
 0x3dc   :  { %v515_v48 = vrot.slane %v510_v47, 5  ;;  %v516_v49 = vrot.slane %v510_v47, 6  ;;  %v1110_v50 = vpop.f32.mrb[5].mxu0 }
 0x3de   :  { %v519_v51 = vadd.f32 %v515_v48, %v1535_v16  ;;  %v520_v52 = vadd.f32 %v516_v49, %v1537_v17 }
 0x3e0   :  { %1248 = vtanh.f32 %v519_v51 }
 0x3e1   :  { %1250 = vtanh.f32 %v520_v52 }
 0x3ea   :  { %v1249_v53 = vpop.eup %1248 }
 0x3eb   :  { %v1251_v54 = vpop.eup %1250  ;;  %524 = vst.msk [vmem:[#allocation2] sm:$0x8] %vm523_vm7, %v1249_v53  ;;  %v528_v55 = vrot.slane %v1249_v53, 3 }
 0x3ec   :  { %525 = vst.msk [vmem:[#allocation2 + $0x8] sm:$0x8] %vm523_vm7, %v1251_v54  ;;  %v529_v56 = vrot.slane %v1251_v54, 2 }
 0x3ee   :  { %v530_v57 = vsel %vm264_vm3, %v529_v56, %v528_v55 }
 0x3ef   :  { %1120 = vmatmul.mubr.msk.f32.vlgmr.msra.gmra.mrb[4].mxu1 %vm176_vm4, %v530_v57 }
 0x3f0   :  { %1208 = vmatpush3.bf16.msra.mxu1 %v1508_v8  ;;  %1141 = vmatprep.mubr.msk.f32.mxu1 %vm1393_vm0, %v1394_v1 }
 0x3f1   :  { %1209 = vmatprep.subr.bf16.mxu1 %v1392_v0 }
 0x3f4   :  { %1211 = vmatpush3.bf16.msra.mxu1 %v1512_v12 }
 0x3f5   :  { %1219 = vmatprep.subr.bf16.mxu1 %v1218_v31 }
 0x4c2   :  { %v599_v58 = vpop.f32.mrb[4].mxu1 }
 0x4c3   :  { %v604_v59 = vrot.slane %v599_v58, 4  ;;  %v605_v60 = vrot.slane %v599_v58, 5  ;;  %v1121_v61 = vpop.f32.mrb[5].mxu1 }
 0x4c5   :  { %v608_v62 = vadd.f32 %v604_v59, %v1535_v16  ;;  %v609_v63 = vadd.f32 %v605_v60, %v1537_v17 }
 0x4c7   :  { %1252 = vtanh.f32 %v608_v62 }
 0x4c8   :  { %1254 = vtanh.f32 %v609_v63 }
 0x4d1   :  { %v1253_v2 = vpop.eup %1252 }
 0x4d2   :  { %v1255_v3 = vpop.eup %1254  ;;  %613 = vst.msk [vmem:[#allocation2] sm:$0x10] %vm612_vm8, %v1253_v2  ;;  %v617_v4 = vrot.slane %v1253_v2, 4 }
 0x4d3   :  { %614 = vst.msk [vmem:[#allocation2 + $0x8] sm:$0x10] %vm612_vm8, %v1255_v3  ;;  %v618_v5 = vrot.slane %v1255_v3, 3 }
 0x4d5   :  { %v619_v6 = vsel %vm264_vm3, %v618_v5, %v617_v4 }
 0x4d6   :  { %1131 = vmatmul.mubr.msk.f32.vlgmr.msra.gmra.mrb[6].mxu0 %vm176_vm4, %v619_v6 }
 0x4d7   :  { %1214 = vmatpush3.bf16.msra.mxu0 %v1508_v8  ;;  %1152 = vmatprep.mubr.msk.f32.mxu0 %vm1393_vm0, %v1394_v1 }
 0x4d8   :  { %1215 = vmatprep.subr.bf16.mxu0 %v1392_v0 }
 0x4db   :  { %1217 = vmatpush3.bf16.msra.mxu0 %v1512_v12 }
 0x5a9   :  { %v688_v7 = vpop.f32.mrb[6].mxu0 }
 0x5aa   :  { %v693_v9 = vrot.slane %v688_v7, 3  ;;  %v694_v10 = vrot.slane %v688_v7, 4  ;;  %v1132_v11 = vpop.f32.mrb[7].mxu0 }
 0x5ac   :  { %v697_v13 = vadd.f32 %v693_v9, %v1535_v16  ;;  %v698_v14 = vadd.f32 %v694_v10, %v1537_v17 }
 0x5ae   :  { %1256 = vtanh.f32 %v697_v13 }
 0x5af   :  { %1258 = vtanh.f32 %v698_v14 }
 0x5b8   :  { %v1257_v15 = vpop.eup %1256 }
 0x5b9   :  { %v1259_v8 = vpop.eup %1258  ;;  %702 = vst.msk [vmem:[#allocation2] sm:$0x20] %vm701_vm9, %v1257_v15  ;;  %v706_v18 = vrot.slane %v1257_v15, 5 }
 0x5ba   :  { %703 = vst.msk [vmem:[#allocation2 + $0x8] sm:$0x20] %vm701_vm9, %v1259_v8  ;;  %v707_v1 = vrot.slane %v1259_v8, 4 }
 0x5bc   :  { %v708_v0 = vsel %vm264_vm3, %v707_v1, %v706_v18 }
 0x5bd   :  { %1142 = vmatmul.mubr.msk.f32.vlgmr.msra.gmra.mrb[6].mxu1 %vm176_vm4, %v708_v0 }
 0x5be   :  { %1221 = vmatpush3.bf16.msra.mxu1 %v1218_v31 }
 0x5bf   :  { %1223 = vmatprep.subr.bf16.mxu1 %v1222_v34 }
 0x5c2   :  { %1225 = vmatpush3.bf16.msra.mxu1 %v1222_v34 }
 0x690   :  { %v777_v12 = vpop.f32.mrb[6].mxu1 }
 0x691   :  { %v782_v19 = vrot.slane %v777_v12, 2  ;;  %v783_v20 = vrot.slane %v777_v12, 3  ;;  %v1143_v21 = vpop.f32.mrb[7].mxu1 }
 0x693   :  { %v786_v22 = vadd.f32 %v782_v19, %v1535_v16  ;;  %v787_v23 = vadd.f32 %v783_v20, %v1537_v17 }
 0x695   :  { %1260 = vtanh.f32 %v786_v22 }
 0x696   :  { %1262 = vtanh.f32 %v787_v23 }
 0x69f   :  { %v1261_v24 = vpop.eup %1260 }
 0x6a0   :  { %v1263_v25 = vpop.eup %1262  ;;  %791 = vst.msk [vmem:[#allocation2] sm:$0x40] %vm790_vm10, %v1261_v24  ;;  %v795_v26 = vrot.slane %v1261_v24, 6 }
 0x6a1   :  { %792 = vst.msk [vmem:[#allocation2 + $0x8] sm:$0x40] %vm790_vm10, %v1263_v25  ;;  %v796_v27 = vrot.slane %v1263_v25, 5 }
 0x6a3   :  { %v797_v28 = vsel %vm264_vm3, %v796_v27, %v795_v26 }
 0x6a4   :  { %1153 = vmatmul.mubr.msk.f32.vlgmr.msra.gmra.mrb[8].mxu0 %vm176_vm4, %v797_v28 }
 0x777   :  { %v866_v35 = vpop.f32.mrb[8].mxu0 }
 0x778   :  { %v871_v36 = vrot.slane %v866_v35, 1  ;;  %v872_v37 = vrot.slane %v866_v35, 2  ;;  %v1154_v38 = vpop.f32.mrb[9].mxu0 }
 0x77a   :  { %v875_v39 = vadd.f32 %v871_v36, %v1535_v16  ;;  %v876_v40 = vadd.f32 %v872_v37, %v1537_v17 }
 0x77c   :  { %1264 = vtanh.f32 %v875_v39 }
 0x77d   :  { %1266 = vtanh.f32 %v876_v40 }
 0x786   :  { %v1265_v41 = vpop.eup %1264 }
 0x787   :  { %v1267_v42 = vpop.eup %1266  ;;  %880 = vst.msk [vmem:[#allocation2] sm:$0x80] %vm879_vm11, %v1265_v41 }
 0x788   :  { %881 = vst.msk [vmem:[#allocation2 + $0x8] sm:$0x80] %vm879_vm11, %v1267_v42 }
 0x78e   :  { %v882_v43 = vld [vmem:[#allocation2] sm:$0xff] }
 0x78f   :  { %1163 = vmatprep.mubr.msk.f32.mxu1 %vm176_vm4, %v882_v43  ;;  %v883_v44 = vld [vmem:[#allocation2 + $0x8] sm:$0xff] }
 0x790   :  { %1164 = vmatmul.mubr.msk.f32.vlgmr.msra.gmra.mrb[8].mxu1 %vm176_vm4, %v883_v44 }
 0x863   :  { %v1165_v16 = vpop.f32.mrb[8].mxu1 }
 0x864   :  { %v973_v17 = vadd.f32 %v1165_v16, %v1007_v45  ;;  %v967_v46 = vpop.f32.mrb[9].mxu1 }
 0x865   :  { %v968_v47 = vadd.f32 %v1007_v45, %v967_v46 }
 0x866   :  { %977 = vst [vmem:[#allocation11 + $0x8] sm:$0xff] %v973_v17 }
 0x867   :  { %976 = vst [vmem:[#allocation11] sm:$0xff] %v968_v47 }
 0x868   :  { %1367 = shalt.err (!%p1364_p8)
}
 0x869   :  { %s1368_s5 = scalar_lea.hbm %s1623_s6, 256 }
 0x86a   :  { %p1369_p9 = scmp.ne.s32.totalorder %s1623_s6, %s1368_s5  ;;  %p1372_p10 = scmp.lt.u32.totalorder %s1368_s5, %s1623_s6 }
 0x86c   :  { %p1374_p11 = pnand %p1372_p10, %p1369_p9 }
 0x86e   :  { %1377 = shalt.err (!%p1374_p11)
}
 0x86f   :  { %989 = dma.vmem_to_hbm [thread:$0]  %s984_s25, 256, %s1623_s6, [#allocation5], %s1388_s9, %s1388_s9, %s1389_s10  }
 0x870   :  { %1384 = dma.done.wait [#allocation5], 256  }
 0x871   :  { %1385 = vsyncadd [#allocation5], 4294967040 }
 0x872   :  { %993 = vsyncpa [#allocation4], 1 }
 0x873   :  { %994 = vsyncpa [#allocation7], 1 }
 0x874   :  { %995 = vsyncpa [#allocation10], 1 }
 0x875   :  { %996 = vsyncpa [#allocation5], 1 }

</bundles_post_ra>
